<compile_context>
chip_gen: v7x
topology: tpu7x:2x2x1
jax: 0.10.0
libtpu: 0.0.40
codegen_flags: <defaults>
</compile_context>

<pallas_src>
import functools

import jax
import jax.numpy as jnp
from jax.experimental import pallas as pl
from jax.experimental.pallas import tpu as pltpu

LANES = 128


def _mlp_kernel(x_ref, w1_ref, b1_ref, w2_ref, b2_ref, w3_ref, b3_ref,
                w4_ref, b4_ref, o_ref):
    """Fused 4-layer MLP on one [TB, state] tile:
       relu(relu(relu(x@W1+b1)@W2+b2)@W3+b3)@W4+b4."""
    # bf16 matmul inputs, f32 MXU accumulation; bias add / ReLU stay in f32
    # (v5e has no bf16 VPU path), only cast down right before the next dot.
    h = x_ref[...].astype(jnp.bfloat16)

    h = jnp.dot(h, w1_ref[...], preferred_element_type=jnp.float32) + b1_ref[...]
    h = jnp.maximum(h, 0.0).astype(jnp.bfloat16)

    h = jnp.dot(h, w2_ref[...], preferred_element_type=jnp.float32) + b2_ref[...]
    h = jnp.maximum(h, 0.0).astype(jnp.bfloat16)

    h = jnp.dot(h, w3_ref[...], preferred_element_type=jnp.float32) + b3_ref[...]
    h = jnp.maximum(h, 0.0).astype(jnp.bfloat16)

    h = jnp.dot(h, w4_ref[...], preferred_element_type=jnp.float32) + b4_ref[...]
    o_ref[...] = h.astype(o_ref.dtype)


def linear_network1_forward(x, params, *, block_b=256):
    """x: [B, state_size] float32. params: w1..w4 ([in, out]) and b1..b4 ([1, out]), f32."""
    B, state_size = x.shape
    action_size = params["w4"].shape[1]

    n_b = pl.cdiv(B, block_b)
    b_pad = n_b * block_b
    out_pad = max(LANES, ((action_size + LANES - 1) // LANES) * LANES)

    if b_pad != B:
        x = jnp.pad(x, ((0, b_pad - B), (0, 0)))

    # Matmul operands in bf16; biases stay f32. Pad the last layer to a full
    # 128-lane output slab (padded columns are zero -> sliced off below).
    w1 = params["w1"].astype(jnp.bfloat16)
    w2 = params["w2"].astype(jnp.bfloat16)
    w3 = params["w3"].astype(jnp.bfloat16)
    w4 = jnp.zeros((params["w4"].shape[0], out_pad), jnp.bfloat16)
    w4 = w4.at[:, :action_size].set(params["w4"].astype(jnp.bfloat16))
    b4 = jnp.zeros((1, out_pad), jnp.float32).at[:, :action_size].set(params["b4"])

    weights = (w1, params["b1"], w2, params["b2"], w3, params["b3"], w4, b4)

    # Weights/biases: constant block index across the batch grid => DMA'd once,
    # VMEM-resident for every grid step.  (pl.Buffered(1) would also drop the
    # second buffer, but at ~80 KB of params it is not worth the lowering risk.)
    weight_specs = [pl.BlockSpec(w.shape, lambda i: (0, 0)) for w in weights]

    out = pl.pallas_call(
        _mlp_kernel,
        out_shape=jax.ShapeDtypeStruct((b_pad, out_pad), jnp.float32),
        grid_spec=pltpu.PrefetchScalarGridSpec(
            num_scalar_prefetch=0,
            grid=(n_b,),
            in_specs=[pl.BlockSpec((block_b, state_size), lambda i: (i, 0))]
                     + weight_specs,
            out_specs=pl.BlockSpec((block_b, out_pad), lambda i: (i, 0)),
        ),
        compiler_params=pltpu.CompilerParams(
            # Batch tiles are independent -> shard across v7x's 2 TensorCores.
            dimension_semantics=("parallel",),
        ),
    )(x, *weights)

    return out[:B, :action_size]


def init_params(key, state_size, action_size):
    """Deterministic init matching PyTorch nn.Linear default (U(-1/sqrt(fan_in), +1/sqrt(fan_in)))."""
    sizes = [(state_size, 64), (64, 128), (128, 64), (64, action_size)]
    params = {}
    keys = jax.random.split(key, 2 * len(sizes))
    for i, (fin, fout) in enumerate(sizes):
        bound = 1.0 / jnp.sqrt(jnp.float32(fin))
        w = jax.random.uniform(keys[2 * i], (fin, fout), jnp.float32, -bound, bound)
        b = jax.random.uniform(keys[2 * i + 1], (1, fout), jnp.float32, -bound, bound)
        params[f"w{i+1}"] = w
        params[f"b{i+1}"] = b
    return params


def reference_forward(x, params):
    """Pure-JAX reference using the same bf16-input / f32-accumulate matmuls."""
    h = x
    for i in range(1, 5):
        w = params[f"w{i}"].astype(jnp.bfloat16)
        h = jnp.dot(h.astype(jnp.bfloat16), w,
                    preferred_element_type=jnp.float32) + params[f"b{i}"]
        if i < 4:
            h = jnp.maximum(h, 0.0)
    return h


if __name__ == "__main__":
    # LunarLander-v2: state_size=8, action_size=4.
    state_size, action_size = 8, 4

    key = jax.random.PRNGKey(0)
    kx, kp = jax.random.split(key)
    params = init_params(kp, state_size, action_size)

    fwd = jax.jit(functools.partial(linear_network1_forward, params=params))

    # Batched rollout-style call: 1024 states -> grid of 4 x 256-row tiles.
    x_big = jax.random.normal(kx, (1024, state_size), jnp.float32)
    out_big = jax.block_until_ready(fwd(x_big))
    assert out_big.shape == (1024, action_size)
    assert jnp.allclose(out_big, reference_forward(x_big, params),
                        atol=1e-3, rtol=1e-3), "mismatch vs reference (batched)"

    # Small call exercises the batch-padding path (B < one batch tile).
    x_small = x_big[:8]
    out_small = jax.block_until_ready(fwd(x_small))
    assert out_small.shape == (8, action_size)
    assert jnp.allclose(out_small, out_big[:8], atol=1e-3, rtol=1e-3), \
        "mismatch small vs batched"

    print("KERNEL_OK")
</pallas_src>

<mosaic_0001>
module attributes {stable_mosaic.version = 11 : i64} {
  func.func @_mlp_kernel(%arg0: i32, %arg1: memref<256x8xf32, #tpu.memory_space<vmem>>, %arg2: memref<8x64xbf16, #tpu.memory_space<vmem>>, %arg3: memref<1x64xf32, #tpu.memory_space<vmem>>, %arg4: memref<64x128xbf16, #tpu.memory_space<vmem>>, %arg5: memref<1x128xf32, #tpu.memory_space<vmem>>, %arg6: memref<128x64xbf16, #tpu.memory_space<vmem>>, %arg7: memref<1x64xf32, #tpu.memory_space<vmem>>, %arg8: memref<64x128xbf16, #tpu.memory_space<vmem>>, %arg9: memref<1x128xf32, #tpu.memory_space<vmem>>, %arg10: memref<256x128xf32, #tpu.memory_space<vmem>>) attributes {dimension_semantics = [#tpu.dimension_semantics<parallel>], iteration_bounds = array<i64: 4>, scalar_prefetch = 0 : i64, scratch_operands = 0 : i64, tpu.core_type = #tpu.core_type<tc>, window_params = [{transform_indices = @transform_0, window_bounds = array<i64: 256, 8>}, {pipeline_mode = #tpu.pipeline_mode<synchronous>, transform_indices = @transform_1, window_bounds = array<i64: 8, 64>}, {pipeline_mode = #tpu.pipeline_mode<synchronous>, transform_indices = @transform_2, window_bounds = array<i64: 1, 64>}, {pipeline_mode = #tpu.pipeline_mode<synchronous>, transform_indices = @transform_3, window_bounds = array<i64: 64, 128>}, {pipeline_mode = #tpu.pipeline_mode<synchronous>, transform_indices = @transform_4, window_bounds = array<i64: 1, 128>}, {pipeline_mode = #tpu.pipeline_mode<synchronous>, transform_indices = @transform_5, window_bounds = array<i64: 128, 64>}, {pipeline_mode = #tpu.pipeline_mode<synchronous>, transform_indices = @transform_6, window_bounds = array<i64: 1, 64>}, {pipeline_mode = #tpu.pipeline_mode<synchronous>, transform_indices = @transform_7, window_bounds = array<i64: 64, 128>}, {pipeline_mode = #tpu.pipeline_mode<synchronous>, transform_indices = @transform_8, window_bounds = array<i64: 1, 128>}, {transform_indices = @transform_9, window_bounds = array<i64: 256, 128>}]} {
    %c0 = arith.constant 0 : index
    %c0_0 = arith.constant 0 : index
    %0 = vector.load %arg1[%c0, %c0_0] : memref<256x8xf32, #tpu.memory_space<vmem>>, vector<256x8xf32>
    %1 = arith.truncf %0 : vector<256x8xf32> to vector<256x8xbf16>
    %c0_1 = arith.constant 0 : index
    %c0_2 = arith.constant 0 : index
    %2 = vector.load %arg2[%c0_1, %c0_2] : memref<8x64xbf16, #tpu.memory_space<vmem>>, vector<8x64xbf16>
    %cst = arith.constant dense<0.000000e+00> : vector<256x64xf32>
    %3 = tpu.matmul %1, %2, %cst {dimension_numbers = #tpu.dot_dimension_numbers<[1], [0], [0], [1], [0, 0, 1, 1], [], []>} : vector<256x8xbf16>, vector<8x64xbf16>, vector<256x64xf32> -> vector<256x64xf32>
    %c0_3 = arith.constant 0 : index
    %c0_4 = arith.constant 0 : index
    %4 = vector.load %arg3[%c0_3, %c0_4] : memref<1x64xf32, #tpu.memory_space<vmem>>, vector<1x64xf32>
    %5 = vector.broadcast %4 : vector<1x64xf32> to vector<256x64xf32>
    %6 = arith.addf %3, %5 : vector<256x64xf32>
    %cst_5 = arith.constant 0.000000e+00 : f32
    %7 = vector.broadcast %cst_5 : f32 to vector<256x64xf32>
    %8 = arith.maximumf %6, %7 : vector<256x64xf32>
    %9 = arith.truncf %8 : vector<256x64xf32> to vector<256x64xbf16>
    %c0_6 = arith.constant 0 : index
    %c0_7 = arith.constant 0 : index
    %10 = vector.load %arg4[%c0_6, %c0_7] : memref<64x128xbf16, #tpu.memory_space<vmem>>, vector<64x128xbf16>
    %cst_8 = arith.constant dense<0.000000e+00> : vector<256x128xf32>
    %11 = tpu.matmul %9, %10, %cst_8 {dimension_numbers = #tpu.dot_dimension_numbers<[1], [0], [0], [1], [0, 0, 1, 1], [], []>} : vector<256x64xbf16>, vector<64x128xbf16>, vector<256x128xf32> -> vector<256x128xf32>
    %c0_9 = arith.constant 0 : index
    %c0_10 = arith.constant 0 : index
    %12 = vector.load %arg5[%c0_9, %c0_10] : memref<1x128xf32, #tpu.memory_space<vmem>>, vector<1x128xf32>
    %13 = vector.broadcast %12 : vector<1x128xf32> to vector<256x128xf32>
    %14 = arith.addf %11, %13 : vector<256x128xf32>
    %cst_11 = arith.constant 0.000000e+00 : f32
    %15 = vector.broadcast %cst_11 : f32 to vector<256x128xf32>
    %16 = arith.maximumf %14, %15 : vector<256x128xf32>
    %17 = arith.truncf %16 : vector<256x128xf32> to vector<256x128xbf16>
    %c0_12 = arith.constant 0 : index
    %c0_13 = arith.constant 0 : index
    %18 = vector.load %arg6[%c0_12, %c0_13] : memref<128x64xbf16, #tpu.memory_space<vmem>>, vector<128x64xbf16>
    %cst_14 = arith.constant dense<0.000000e+00> : vector<256x64xf32>
    %19 = tpu.matmul %17, %18, %cst_14 {dimension_numbers = #tpu.dot_dimension_numbers<[1], [0], [0], [1], [0, 0, 1, 1], [], []>} : vector<256x128xbf16>, vector<128x64xbf16>, vector<256x64xf32> -> vector<256x64xf32>
    %c0_15 = arith.constant 0 : index
    %c0_16 = arith.constant 0 : index
    %20 = vector.load %arg7[%c0_15, %c0_16] : memref<1x64xf32, #tpu.memory_space<vmem>>, vector<1x64xf32>
    %21 = vector.broadcast %20 : vector<1x64xf32> to vector<256x64xf32>
    %22 = arith.addf %19, %21 : vector<256x64xf32>
    %cst_17 = arith.constant 0.000000e+00 : f32
    %23 = vector.broadcast %cst_17 : f32 to vector<256x64xf32>
    %24 = arith.maximumf %22, %23 : vector<256x64xf32>
    %25 = arith.truncf %24 : vector<256x64xf32> to vector<256x64xbf16>
    %c0_18 = arith.constant 0 : index
    %c0_19 = arith.constant 0 : index
    %26 = vector.load %arg8[%c0_18, %c0_19] : memref<64x128xbf16, #tpu.memory_space<vmem>>, vector<64x128xbf16>
    %cst_20 = arith.constant dense<0.000000e+00> : vector<256x128xf32>
    %27 = tpu.matmul %25, %26, %cst_20 {dimension_numbers = #tpu.dot_dimension_numbers<[1], [0], [0], [1], [0, 0, 1, 1], [], []>} : vector<256x64xbf16>, vector<64x128xbf16>, vector<256x128xf32> -> vector<256x128xf32>
    %c0_21 = arith.constant 0 : index
    %c0_22 = arith.constant 0 : index
    %28 = vector.load %arg9[%c0_21, %c0_22] : memref<1x128xf32, #tpu.memory_space<vmem>>, vector<1x128xf32>
    %29 = vector.broadcast %28 : vector<1x128xf32> to vector<256x128xf32>
    %30 = arith.addf %27, %29 : vector<256x128xf32>
    %c0_23 = arith.constant 0 : index
    %c0_24 = arith.constant 0 : index
    %31 = vector.load %arg10[%c0_23, %c0_24] : memref<256x128xf32, #tpu.memory_space<vmem>>, vector<256x128xf32>
    tpu.vector_store %arg10[%c0_23, %c0_24], %30 {strides = array<i32>} : memref<256x128xf32, #tpu.memory_space<vmem>>, vector<256x128xf32>,
    return
  }
  func.func @transform_0(%arg0: i32) -> (i32, i32) {
    %c0_i32 = arith.constant 0 : i32
    %c0_i32_0 = arith.constant 0 : i32
    return %arg0, %c0_i32 : i32, i32
  }
  func.func @transform_1(%arg0: i32) -> (i32, i32) {
    %c0_i32 = arith.constant 0 : i32
    %c0_i32_0 = arith.constant 0 : i32
    %c0_i32_1 = arith.constant 0 : i32
    return %c0_i32, %c0_i32_0 : i32, i32
  }
  func.func @transform_2(%arg0: i32) -> (i32, i32) {
    %c0_i32 = arith.constant 0 : i32
    %c0_i32_0 = arith.constant 0 : i32
    %c0_i32_1 = arith.constant 0 : i32
    return %c0_i32, %c0_i32_0 : i32, i32
  }
  func.func @transform_3(%arg0: i32) -> (i32, i32) {
    %c0_i32 = arith.constant 0 : i32
    %c0_i32_0 = arith.constant 0 : i32
    %c0_i32_1 = arith.constant 0 : i32
    return %c0_i32, %c0_i32_0 : i32, i32
  }
  func.func @transform_4(%arg0: i32) -> (i32, i32) {
    %c0_i32 = arith.constant 0 : i32
    %c0_i32_0 = arith.constant 0 : i32
    %c0_i32_1 = arith.constant 0 : i32
    return %c0_i32, %c0_i32_0 : i32, i32
  }
  func.func @transform_5(%arg0: i32) -> (i32, i32) {
    %c0_i32 = arith.constant 0 : i32
    %c0_i32_0 = arith.constant 0 : i32
    %c0_i32_1 = arith.constant 0 : i32
    return %c0_i32, %c0_i32_0 : i32, i32
  }
  func.func @transform_6(%arg0: i32) -> (i32, i32) {
    %c0_i32 = arith.constant 0 : i32
    %c0_i32_0 = arith.constant 0 : i32
    %c0_i32_1 = arith.constant 0 : i32
    return %c0_i32, %c0_i32_0 : i32, i32
  }
  func.func @transform_7(%arg0: i32) -> (i32, i32) {
    %c0_i32 = arith.constant 0 : i32
    %c0_i32_0 = arith.constant 0 : i32
    %c0_i32_1 = arith.constant 0 : i32
    return %c0_i32, %c0_i32_0 : i32, i32
  }
  func.func @transform_8(%arg0: i32) -> (i32, i32) {
    %c0_i32 = arith.constant 0 : i32
    %c0_i32_0 = arith.constant 0 : i32
    %c0_i32_1 = arith.constant 0 : i32
    return %c0_i32, %c0_i32_0 : i32, i32
  }
  func.func @transform_9(%arg0: i32) -> (i32, i32) {
    %c0_i32 = arith.constant 0 : i32
    %c0_i32_0 = arith.constant 0 : i32
    return %arg0, %c0_i32 : i32, i32
  }
}

</mosaic_0001>

<bundles_post_ra>
// kernel: linear_network1_forward.1
= control target key start
LH: loop header
LB: loop body
LE: loop exit
PB: predicated region body
PF: predicated region fallthrough
CT: control target
= control target key end

     0   :  { %s1973_s30 = smov 0   ;;  %s2312_s0 = inlined_call_operand.vmem [shape: f32[1024,8], index: 0, kind: input, shape index: {}]   ;;  %s2313_s1 = inlined_call_operand.vmem [shape: bf16[8,64], index: 1, kind: input, shape index: {}]   ;;  %s2314_s2 = inlined_call_operand.vmem [shape: f32[1,64], index: 2, kind: input, shape index: {}]   ;;  %s2315_s3 = inlined_call_operand.vmem [shape: bf16[64,128], index: 3, kind: input, shape index: {}]   ;;  %s2316_s4 = inlined_call_operand.vmem [shape: f32[1,128], index: 4, kind: input, shape index: {}]   ;;  %s2317_s5 = inlined_call_operand.vmem [shape: bf16[128,64], index: 5, kind: input, shape index: {}]   ;;  %s2318_s6 = inlined_call_operand.vmem [shape: f32[1,64], index: 6, kind: input, shape index: {}]   ;;  %s2319_s7 = inlined_call_operand.vmem [shape: bf16[64,128], index: 7, kind: input, shape index: {}]   ;;  %s2320_s8 = inlined_call_operand.vmem [shape: f32[1,128], index: 8, kind: input, shape index: {}]   ;;  %s2321_s9 = inlined_call_operand.vmem [shape: f32[1024,128], index: 9, kind: output, shape index: {}]  }
   0x1 LB: > { %s1568_s10 = sadd.s32 4294967295, %s1921_s30   ;;  %p1572_p0 = scmp.ge.s32.totalorder %s1921_s30, 1  ;;  %s1921_s30 = sphi %s1973_s30, %s19_s30  }
   0x2   : > { %p288_p1 = scmp.lt.s32.totalorder %s1921_s30, 5 }
   0x4   : > { %p289_p2 = pnand %p1572_p0, %p288_p1 }
   0x5   : > { %v385_v0 = vld [vmem:[%s2313_s1] sm:$0xf] (!%p289_p2)  ;;  %vm442_vm0 = vcmask (!%p289_p2), 1043456   ;;  %s1573_s13 = sshll.u32 (!%p289_p2), %s1568_s10, 5  ;;  %v1900_v3 = vld [vmem:[%s2315_s3 + $0x8] sm:$0xff] (!%p289_p2)   ;;  %vm393_vm1 = vcmask (!%p289_p2), 64512  }
   0x6   : > { %292 = sbr.rel (%p289_p2) target bundleno = 960 (0x3c0), region = 56  ;;  %v1899_v1 = vld [vmem:[%s2315_s3] sm:$0xff] (!%p289_p2)   ;;  %1890 = vmatprep.subr.msk.bf16.mxu0 (!%p289_p2), %vm442_vm0, %v385_v0  ;;  %v444_v2 = vsel (!%p289_p2), %vm442_vm0, %v385_v0, 0  ;;  %p325_p3 = scmp.lt.s32.totalorder (!%p289_p2), %s1573_s13, 127  ;;  %v1901_v52 = vld [vmem:[%s2315_s3 + $0x10] sm:$0xff] (!%p289_p2)   ;;  %v1902_v53 = vld [vmem:[%s2315_s3 + $0x18] sm:$0xff] (!%p289_p2)  }
   0x7   : > { %1729 = vmatpush3.bf16.msra.mxu0 (!%p289_p2), %v444_v2  ;;  %1762 = vmatprep.subr.bf16.mxu1 (!%p289_p2), %v1899_v1  ;;  %v1903_v54 = vld [vmem:[%s2317_s5] sm:$0xff] (!%p289_p2)   ;;  %v1904_v55 = vld [vmem:[%s2317_s5 + $0x8] sm:$0xff] (!%p289_p2)   ;;  %v1905_v56 = vld [vmem:[%s2317_s5 + $0x10] sm:$0xff] (!%p289_p2)   ;;  %vm694_vm2 = vcmask (!%p289_p2), 523264  }
   0x8   : > { %1763 = vmatpush3.bf16.msra.mxu1 (!%p289_p2), %v1899_v1  ;;  %1802 = vmatprep.subr.bf16.mxu0 (!%p289_p2), %v1903_v54  ;;  %v1906_v57 = vld [vmem:[%s2317_s5 + $0x18] sm:$0xff] (!%p289_p2)   ;;  %v1907_v58 = vld [vmem:[%s2317_s5 + $0x20] sm:$0xff] (!%p289_p2)   ;;  %v1908_v59 = vld [vmem:[%s2317_s5 + $0x28] sm:$0xff] (!%p289_p2)  }
   0x9   : > { %1764 = vmatprep.subr.bf16.mxu1 (!%p289_p2), %v1900_v3  ;;  %v1909_v60 = vld [vmem:[%s2317_s5 + $0x30] sm:$0xff] (!%p289_p2)   ;;  %v2078_v61 = vld [vmem:[%s2314_s2] ss:$0 sm:$0xff] (!%p289_p2) }
   0xc   : > { %1765 = vmatpush3.bf16.msra.mxu1 (!%p289_p2), %v1900_v3 }
   0xd   : > { %s2323_s13 = smov (!%p325_p3, %s1573_s13), 127  ;;  %1766 = vmatprep.subr.bf16.mxu1 %v1901_v52 }
   0xe   : > { %s1574_s18 = sshll.u32 %s2323_s13, 3 }
   0xf   : > { %s1998_s21 = scalar_lea.vmem %s2312_s0, %s1574_s18  ;;  %s2243_s24 = scalar_lea.vmem %s2321_s9, %s1574_s18 }
  0x10   : > { %v337_v4 = vld [vmem:[%s1998_s21] sm:$0xff]  ;;  %v338_v5 = vld [vmem:[%s1998_s21 + $0x8] sm:$0xff]  ;;  %v339_v6 = vld [vmem:[%s1998_s21 + $0x10] sm:$0xff]  ;;  %1767 = vmatpush3.bf16.msra.mxu1 %v1901_v52 }
  0x11   : > { %v369_v7 = vpack.c.bf16 %v338_v5, %v337_v4  ;;  %v340_v8 = vld [vmem:[%s1998_s21 + $0x18] sm:$0xff]  ;;  %v341_v9 = vld [vmem:[%s1998_s21 + $0x20] sm:$0xff]  ;;  %v342_v10 = vld [vmem:[%s1998_s21 + $0x28] sm:$0xff]  ;;  %1768 = vmatprep.subr.bf16.mxu1 %v1902_v53 }
  0x12   : > { %v370_v11 = vpack.c.bf16 %v340_v8, %v339_v6  ;;  %v371_v12 = vpack.c.bf16 %v342_v10, %v341_v9  ;;  %v343_v13 = vld [vmem:[%s1998_s21 + $0x30] sm:$0xff]  ;;  %v344_v14 = vld [vmem:[%s1998_s21 + $0x38] sm:$0xff]  ;;  %v345_v15 = vld [vmem:[%s1998_s21 + $0x40] sm:$0xff] }
  0x13   : > { %1730 = vmatprep.mubr.msk.bf16.mxu0 %vm393_vm1, %v369_v7  ;;  %v346_v16 = vld [vmem:[%s1998_s21 + $0x48] sm:$0xff]  ;;  %v372_v17 = vpack.c.bf16 %v344_v14, %v343_v13  ;;  %v347_v19 = vld [vmem:[%s1998_s21 + $0x50] sm:$0xff]  ;;  %v348_v20 = vld [vmem:[%s1998_s21 + $0x58] sm:$0xff] }
  0x14   : > { %1731 = vmatmul.mubr.msk.bf16.vlgmr.msra.gmra.mrb[0].mxu0 %vm393_vm1, %v370_v11  ;;  %v373_v18 = vpack.c.bf16 %v346_v16, %v345_v15  ;;  %v349_v21 = vld [vmem:[%s1998_s21 + $0x60] sm:$0xff]  ;;  %v350_v22 = vld [vmem:[%s1998_s21 + $0x68] sm:$0xff]  ;;  %v374_v23 = vpack.c.bf16 %v348_v20, %v347_v19  ;;  %v351_v25 = vld [vmem:[%s1998_s21 + $0x70] sm:$0xff]  ;;  %1769 = vmatpush3.bf16.msra.mxu1 %v1902_v53 }
  0x15   : > { %1734 = vmatprep.mubr.msk.bf16.mxu0 %vm393_vm1, %v371_v12  ;;  %v375_v24 = vpack.c.bf16 %v350_v22, %v349_v21  ;;  %v352_v26 = vld [vmem:[%s1998_s21 + $0x78] sm:$0xff]  ;;  %v353_v27 = vld [vmem:[%s1998_s21 + $0x80] sm:$0xff]  ;;  %v354_v28 = vld [vmem:[%s1998_s21 + $0x88] sm:$0xff]  ;;  %1803 = vmatpush3.bf16.msra.mxu0 %v1903_v54 }
  0x16   : > { %v376_v29 = vpack.c.bf16 %v352_v26, %v351_v25  ;;  %v377_v30 = vpack.c.bf16 %v354_v28, %v353_v27  ;;  %v355_v31 = vld [vmem:[%s1998_s21 + $0x90] sm:$0xff]  ;;  %v356_v32 = vld [vmem:[%s1998_s21 + $0x98] sm:$0xff]  ;;  %v357_v33 = vld [vmem:[%s1998_s21 + $0xa0] sm:$0xff]  ;;  %1804 = vmatprep.subr.bf16.mxu0 %v1904_v55 }
  0x17   : > { %v358_v34 = vld [vmem:[%s1998_s21 + $0xa8] sm:$0xff]  ;;  %v378_v35 = vpack.c.bf16 %v356_v32, %v355_v31  ;;  %v359_v37 = vld [vmem:[%s1998_s21 + $0xb0] sm:$0xff]  ;;  %v360_v38 = vld [vmem:[%s1998_s21 + $0xb8] sm:$0xff] }
  0x18   : > { %v379_v36 = vpack.c.bf16 %v358_v34, %v357_v33  ;;  %v361_v39 = vld [vmem:[%s1998_s21 + $0xc0] sm:$0xff]  ;;  %v362_v40 = vld [vmem:[%s1998_s21 + $0xc8] sm:$0xff]  ;;  %v380_v41 = vpack.c.bf16 %v360_v38, %v359_v37  ;;  %v363_v43 = vld [vmem:[%s1998_s21 + $0xd0] sm:$0xff] }
  0x19   : > { %v381_v42 = vpack.c.bf16 %v362_v40, %v361_v39  ;;  %v364_v44 = vld [vmem:[%s1998_s21 + $0xd8] sm:$0xff]  ;;  %v365_v45 = vld [vmem:[%s1998_s21 + $0xe0] sm:$0xff]  ;;  %v366_v46 = vld [vmem:[%s1998_s21 + $0xe8] sm:$0xff]  ;;  %1805 = vmatpush3.bf16.msra.mxu0 %v1904_v55 }
  0x1a   : > { %v382_v47 = vpack.c.bf16 %v364_v44, %v363_v43  ;;  %v383_v48 = vpack.c.bf16 %v366_v46, %v365_v45  ;;  %v367_v49 = vld [vmem:[%s1998_s21 + $0xf0] sm:$0xff]  ;;  %v368_v50 = vld [vmem:[%s1998_s21 + $0xf8] sm:$0xff]  ;;  %1806 = vmatprep.subr.bf16.mxu0 %v1905_v56 }
  0x1b   : > { %v384_v51 = vpack.c.bf16 %v368_v50, %v367_v49 }
  0x1c   : > { %1735 = vmatmul.mubr.msk.bf16.gmra.mrb[4].mxu0 %vm393_vm1, %v372_v17 }
  0x1d   : > { %1738 = vmatprep.mubr.msk.bf16.mxu0 %vm393_vm1, %v373_v18  ;;  %1807 = vmatpush3.bf16.msra.mxu0 %v1905_v56 }
  0x1e   : > { %1808 = vmatprep.subr.bf16.mxu0 %v1906_v57 }
  0x21   : > { %1809 = vmatpush3.bf16.msra.mxu0 %v1906_v57 }
  0x22   : > { %1810 = vmatprep.subr.bf16.mxu0 %v1907_v58 }
  0x24   : > { %1739 = vmatmul.mubr.msk.bf16.gmra.mrb[8].mxu0 %vm393_vm1, %v374_v23 }
  0x25   : > { %1742 = vmatprep.mubr.msk.bf16.mxu0 %vm393_vm1, %v375_v24  ;;  %1811 = vmatpush3.bf16.msra.mxu0 %v1907_v58 }
  0x26   : > { %1812 = vmatprep.subr.bf16.mxu0 %v1908_v59 }
  0x29   : > { %1813 = vmatpush3.bf16.msra.mxu0 %v1908_v59 }
  0x2a   : > { %1814 = vmatprep.subr.bf16.mxu0 %v1909_v60 }
  0x2c   : > { %1743 = vmatmul.mubr.msk.bf16.gmra.mrb[12].mxu0 %vm393_vm1, %v376_v29 }
  0x2d   : > { %1746 = vmatprep.mubr.msk.bf16.mxu0 %vm393_vm1, %v377_v30  ;;  %1815 = vmatpush3.bf16.msra.mxu0 %v1909_v60 }
  0x34   : > { %1747 = vmatmul.mubr.msk.bf16.gmra.mrb[16].mxu0 %vm393_vm1, %v378_v35 }
  0x35   : > { %1750 = vmatprep.mubr.msk.bf16.mxu0 %vm393_vm1, %v379_v36 }
  0x3c   : > { %1751 = vmatmul.mubr.msk.bf16.gmra.mrb[20].mxu0 %vm393_vm1, %v380_v41 }
  0x3d   : > { %1754 = vmatprep.mubr.msk.bf16.mxu0 %vm393_vm1, %v381_v42 }
  0x44   : > { %1755 = vmatmul.mubr.msk.bf16.gmra.mrb[24].mxu0 %vm393_vm1, %v382_v47 }
  0x45   : > { %1758 = vmatprep.mubr.msk.bf16.mxu0 %vm393_vm1, %v383_v48 }
  0x4c   : > { %1759 = vmatmul.mubr.msk.bf16.gmra.mrb[28].mxu0 %vm393_vm1, %v384_v51 }
  0xe7   : > { %v1732_v62 = vpop.f32.mrb[0].mxu0 }
  0xe8   : > { %v489_v63 = vadd.f32 %v1732_v62, %v2078_v61  ;;  %v480_v0 = vpop.f32.mrb[1].mxu0 }
  0xe9   : > { %v481_v1 = vadd.f32 %v2078_v61, %v480_v0  ;;  %v1733_v2 = vpop.f32.mrb[2].mxu0 }
  0xea   : > { %v492_v3 = vadd.f32 %v1733_v2, %v2078_v61  ;;  %v483_v4 = vpop.f32.mrb[3].mxu0  ;;  %v609_v6 = vmax.f32 %v489_v63, 0.0 }
  0xeb   : > { %v484_v5 = vadd.f32 %v2078_v61, %v483_v4  ;;  %v607_v8 = vmax.f32 %v481_v1, 0.0 }
  0xec   : > { %v610_v7 = vmax.f32 %v492_v3, 0.0 }
  0xed   : > { %v608_v9 = vmax.f32 %v484_v5, 0.0 }
  0xee   : > { %v640_v10 = vpack.c.bf16 %v610_v7, %v609_v6 }
  0xef   : > { %v1736_v11 = vpop.f32.mrb[4].mxu0  ;;  %v639_v12 = vpack.c.bf16 %v608_v9, %v607_v8 }
  0xf0   : > { %v505_v13 = vadd.f32 %v1736_v11, %v2078_v61  ;;  %v496_v14 = vpop.f32.mrb[5].mxu0 }
  0xf1   : > { %v497_v15 = vadd.f32 %v2078_v61, %v496_v14  ;;  %v1737_v16 = vpop.f32.mrb[6].mxu0  ;;  %1770 = vmatprep.mubr.msk.bf16.mxu1 %vm694_vm2, %v639_v12 }
  0xf2   : > { %v508_v17 = vadd.f32 %v1737_v16, %v2078_v61  ;;  %v499_v18 = vpop.f32.mrb[7].mxu0  ;;  %1771 = vmatmul.mubr.msk.bf16.vlgmr.msra.gmra.mrb[0].mxu1 %vm694_vm2, %v640_v10  ;;  %v613_v20 = vmax.f32 %v505_v13, 0.0 }
  0xf3   : > { %v500_v19 = vadd.f32 %v2078_v61, %v499_v18  ;;  %v611_v22 = vmax.f32 %v497_v15, 0.0 }
  0xf4   : > { %v614_v21 = vmax.f32 %v508_v17, 0.0 }
  0xf5   : > { %v612_v23 = vmax.f32 %v500_v19, 0.0 }
  0xf6   : > { %v642_v24 = vpack.c.bf16 %v614_v21, %v613_v20 }
  0xf7   : > { %v641_v25 = vpack.c.bf16 %v612_v23, %v611_v22  ;;  %v1740_v26 = vpop.f32.mrb[8].mxu0 }
  0xf8   : > { %v521_v27 = vadd.f32 %v1740_v26, %v2078_v61  ;;  %v512_v28 = vpop.f32.mrb[9].mxu0 }
  0xf9   : > { %v513_v29 = vadd.f32 %v2078_v61, %v512_v28  ;;  %v1741_v30 = vpop.f32.mrb[10].mxu0  ;;  %1774 = vmatprep.mubr.msk.bf16.mxu1 %vm694_vm2, %v641_v25 }
  0xfa   : > { %v524_v31 = vadd.f32 %v1741_v30, %v2078_v61  ;;  %v515_v32 = vpop.f32.mrb[11].mxu0  ;;  %1775 = vmatmul.mubr.msk.bf16.gmra.mrb[4].mxu1 %vm694_vm2, %v642_v24  ;;  %v617_v34 = vmax.f32 %v521_v27, 0.0 }
  0xfb   : > { %v516_v33 = vadd.f32 %v2078_v61, %v515_v32  ;;  %v615_v36 = vmax.f32 %v513_v29, 0.0 }
  0xfc   : > { %v618_v35 = vmax.f32 %v524_v31, 0.0 }
  0xfd   : > { %v616_v37 = vmax.f32 %v516_v33, 0.0 }
  0xfe   : > { %v644_v38 = vpack.c.bf16 %v618_v35, %v617_v34 }
  0xff   : > { %v643_v39 = vpack.c.bf16 %v616_v37, %v615_v36  ;;  %v1744_v40 = vpop.f32.mrb[12].mxu0 }
 0x100   : > { %v537_v41 = vadd.f32 %v1744_v40, %v2078_v61  ;;  %v528_v42 = vpop.f32.mrb[13].mxu0 }
 0x101   : > { %v529_v43 = vadd.f32 %v2078_v61, %v528_v42  ;;  %v1745_v44 = vpop.f32.mrb[14].mxu0  ;;  %1778 = vmatprep.mubr.msk.bf16.mxu1 %vm694_vm2, %v643_v39 }
 0x102   : > { %v540_v45 = vadd.f32 %v1745_v44, %v2078_v61  ;;  %v531_v46 = vpop.f32.mrb[15].mxu0  ;;  %1779 = vmatmul.mubr.msk.bf16.gmra.mrb[8].mxu1 %vm694_vm2, %v644_v38  ;;  %v621_v48 = vmax.f32 %v537_v41, 0.0 }
 0x103   : > { %v532_v47 = vadd.f32 %v2078_v61, %v531_v46  ;;  %v619_v50 = vmax.f32 %v529_v43, 0.0 }
 0x104   : > { %v622_v49 = vmax.f32 %v540_v45, 0.0 }
 0x105   : > { %v620_v51 = vmax.f32 %v532_v47, 0.0  ;;  %v1910_v47 = vld [vmem:[%s2317_s5 + $0x38] sm:$0xff]  }
 0x106   : > { %v646_v52 = vpack.c.bf16 %v622_v49, %v621_v48  ;;  %1816 = vmatprep.subr.bf16.mxu0 %v1910_v47  ;;  %v1912_v48 = vld [vmem:[%s2319_s7 + $0x8] sm:$0xff]   ;;  %v1913_v49 = vld [vmem:[%s2319_s7 + $0x10] sm:$0xff]  }
 0x107   : > { %v645_v53 = vpack.c.bf16 %v620_v51, %v619_v50  ;;  %v1748_v54 = vpop.f32.mrb[16].mxu0  ;;  %1817 = vmatpush3.bf16.msra.mxu0 %v1910_v47  ;;  %v1914_v50 = vld [vmem:[%s2319_s7 + $0x18] sm:$0xff]   ;;  %v2146_v51 = vld [vmem:[%s2316_s4] ss:$0 sm:$0xff] }
 0x108   : > { %v553_v55 = vadd.f32 %v1748_v54, %v2078_v61  ;;  %v544_v56 = vpop.f32.mrb[17].mxu0 }
 0x109   : > { %v545_v57 = vadd.f32 %v2078_v61, %v544_v56  ;;  %v1749_v58 = vpop.f32.mrb[18].mxu0  ;;  %1782 = vmatprep.mubr.msk.bf16.mxu1 %vm694_vm2, %v645_v53 }
 0x10a   : > { %v556_v59 = vadd.f32 %v1749_v58, %v2078_v61  ;;  %v547_v60 = vpop.f32.mrb[19].mxu0  ;;  %1783 = vmatmul.mubr.msk.bf16.gmra.mrb[12].mxu1 %vm694_vm2, %v646_v52  ;;  %v625_v63 = vmax.f32 %v553_v55, 0.0 }
 0x10b   : > { %v548_v62 = vadd.f32 %v2078_v61, %v547_v60  ;;  %v623_v1 = vmax.f32 %v545_v57, 0.0 }
 0x10c   : > { %v626_v0 = vmax.f32 %v556_v59, 0.0 }
 0x10d   : > { %v624_v2 = vmax.f32 %v548_v62, 0.0 }
 0x10e   : > { %v648_v3 = vpack.c.bf16 %v626_v0, %v625_v63 }
 0x10f   : > { %v647_v4 = vpack.c.bf16 %v624_v2, %v623_v1  ;;  %v1752_v5 = vpop.f32.mrb[20].mxu0 }
 0x110   : > { %v569_v6 = vadd.f32 %v1752_v5, %v2078_v61  ;;  %v560_v7 = vpop.f32.mrb[21].mxu0 }
 0x111   : > { %v561_v8 = vadd.f32 %v2078_v61, %v560_v7  ;;  %v1753_v9 = vpop.f32.mrb[22].mxu0  ;;  %1786 = vmatprep.mubr.msk.bf16.mxu1 %vm694_vm2, %v647_v4 }
 0x112   : > { %v572_v10 = vadd.f32 %v1753_v9, %v2078_v61  ;;  %v563_v11 = vpop.f32.mrb[23].mxu0  ;;  %1787 = vmatmul.mubr.msk.bf16.gmra.mrb[16].mxu1 %vm694_vm2, %v648_v3  ;;  %v629_v13 = vmax.f32 %v569_v6, 0.0 }
 0x113   : > { %v564_v12 = vadd.f32 %v2078_v61, %v563_v11  ;;  %v627_v15 = vmax.f32 %v561_v8, 0.0 }
 0x114   : > { %v630_v14 = vmax.f32 %v572_v10, 0.0 }
 0x115   : > { %v628_v16 = vmax.f32 %v564_v12, 0.0 }
 0x116   : > { %v650_v17 = vpack.c.bf16 %v630_v14, %v629_v13 }
 0x117   : > { %v649_v18 = vpack.c.bf16 %v628_v16, %v627_v15  ;;  %v1756_v19 = vpop.f32.mrb[24].mxu0 }
 0x118   : > { %v585_v20 = vadd.f32 %v1756_v19, %v2078_v61  ;;  %v576_v21 = vpop.f32.mrb[25].mxu0 }
 0x119   : > { %v577_v22 = vadd.f32 %v2078_v61, %v576_v21  ;;  %v1757_v23 = vpop.f32.mrb[26].mxu0  ;;  %1790 = vmatprep.mubr.msk.bf16.mxu1 %vm694_vm2, %v649_v18 }
 0x11a   : > { %v588_v24 = vadd.f32 %v1757_v23, %v2078_v61  ;;  %v579_v25 = vpop.f32.mrb[27].mxu0  ;;  %1791 = vmatmul.mubr.msk.bf16.gmra.mrb[20].mxu1 %vm694_vm2, %v650_v17  ;;  %v633_v27 = vmax.f32 %v585_v20, 0.0 }
 0x11b   : > { %v580_v26 = vadd.f32 %v2078_v61, %v579_v25  ;;  %v631_v29 = vmax.f32 %v577_v22, 0.0 }
 0x11c   : > { %v634_v28 = vmax.f32 %v588_v24, 0.0 }
 0x11d   : > { %v632_v30 = vmax.f32 %v580_v26, 0.0 }
 0x11e   : > { %v652_v31 = vpack.c.bf16 %v634_v28, %v633_v27 }
 0x11f   : > { %v651_v32 = vpack.c.bf16 %v632_v30, %v631_v29  ;;  %v1760_v33 = vpop.f32.mrb[28].mxu0 }
 0x120   : > { %v601_v34 = vadd.f32 %v1760_v33, %v2078_v61  ;;  %v592_v35 = vpop.f32.mrb[29].mxu0 }
 0x121   : > { %v593_v36 = vadd.f32 %v2078_v61, %v592_v35  ;;  %v1761_v37 = vpop.f32.mrb[30].mxu0  ;;  %1794 = vmatprep.mubr.msk.bf16.mxu1 %vm694_vm2, %v651_v32 }
 0x122   : > { %v604_v38 = vadd.f32 %v1761_v37, %v2078_v61  ;;  %v595_v39 = vpop.f32.mrb[31].mxu0  ;;  %1795 = vmatmul.mubr.msk.bf16.gmra.mrb[24].mxu1 %vm694_vm2, %v652_v31  ;;  %v637_v41 = vmax.f32 %v601_v34, 0.0 }
 0x123   : > { %v596_v40 = vadd.f32 %v2078_v61, %v595_v39  ;;  %v635_v43 = vmax.f32 %v593_v36, 0.0  ;;  %v1911_v61 = vld [vmem:[%s2319_s7] sm:$0xff]  }
 0x124   : > { %v638_v42 = vmax.f32 %v604_v38, 0.0  ;;  %1850 = vmatprep.subr.bf16.mxu1 %v1911_v61 }
 0x125   : > { %v636_v44 = vmax.f32 %v596_v40, 0.0  ;;  %1851 = vmatpush3.bf16.msra.mxu1 %v1911_v61 }
 0x126   : > { %v654_v45 = vpack.c.bf16 %v638_v42, %v637_v41  ;;  %1852 = vmatprep.subr.bf16.mxu1 %v1912_v48 }
 0x127   : > { %v653_v46 = vpack.c.bf16 %v636_v44, %v635_v43 }
 0x129   : > { %1798 = vmatprep.mubr.msk.bf16.mxu1 %vm694_vm2, %v653_v46  ;;  %1853 = vmatpush3.bf16.msra.mxu1 %v1912_v48 }
 0x12a   : > { %1799 = vmatmul.mubr.msk.bf16.gmra.mrb[28].mxu1 %vm694_vm2, %v654_v45  ;;  %1854 = vmatprep.subr.bf16.mxu1 %v1913_v49 }
 0x12d   : > { %1855 = vmatpush3.bf16.msra.mxu1 %v1913_v49 }
 0x12e   : > { %1856 = vmatprep.subr.bf16.mxu1 %v1914_v50 }
 0x131   : > { %1857 = vmatpush3.bf16.msra.mxu1 %v1914_v50 }
 0x1c5   : > { %v1772_v52 = vpop.f32.mrb[0].mxu1 }
 0x1c6   : > { %v786_v53 = vadd.f32 %v1772_v52, %v2146_v51  ;;  %v777_v54 = vpop.f32.mrb[1].mxu1 }
 0x1c7   : > { %v778_v55 = vadd.f32 %v2146_v51, %v777_v54  ;;  %v1773_v56 = vpop.f32.mrb[2].mxu1 }
 0x1c8   : > { %v789_v57 = vadd.f32 %v1773_v56, %v2146_v51  ;;  %v780_v58 = vpop.f32.mrb[3].mxu1  ;;  %v906_v60 = vmax.f32 %v786_v53, 0.0 }
 0x1c9   : > { %v781_v59 = vadd.f32 %v2146_v51, %v780_v58  ;;  %v904_v63 = vmax.f32 %v778_v55, 0.0 }
 0x1ca   : > { %v907_v62 = vmax.f32 %v789_v57, 0.0 }
 0x1cb   : > { %v905_v0 = vmax.f32 %v781_v59, 0.0 }
 0x1cc   : > { %v937_v1 = vpack.c.bf16 %v907_v62, %v906_v60 }
 0x1cd   : > { %v936_v2 = vpack.c.bf16 %v905_v0, %v904_v63  ;;  %v1776_v3 = vpop.f32.mrb[4].mxu1 }
 0x1ce   : > { %v802_v4 = vadd.f32 %v1776_v3, %v2146_v51  ;;  %v793_v5 = vpop.f32.mrb[5].mxu1 }
 0x1cf   : > { %v794_v6 = vadd.f32 %v2146_v51, %v793_v5  ;;  %v1777_v7 = vpop.f32.mrb[6].mxu1  ;;  %1818 = vmatprep.mubr.bf16.mxu0 %v936_v2 }
 0x1d0   : > { %v805_v8 = vadd.f32 %v1777_v7, %v2146_v51  ;;  %v796_v9 = vpop.f32.mrb[7].mxu1  ;;  %1819 = vmatmul.mubr.bf16.vlgmr.msra.gmra.mrb[32].mxu0 %v937_v1  ;;  %v910_v11 = vmax.f32 %v802_v4, 0.0 }
 0x1d1   : > { %v797_v10 = vadd.f32 %v2146_v51, %v796_v9  ;;  %v908_v13 = vmax.f32 %v794_v6, 0.0 }
 0x1d2   : > { %v911_v12 = vmax.f32 %v805_v8, 0.0 }
 0x1d3   : > { %v909_v14 = vmax.f32 %v797_v10, 0.0 }
 0x1d4   : > { %v939_v15 = vpack.c.bf16 %v911_v12, %v910_v11 }
 0x1d5   : > { %v938_v16 = vpack.c.bf16 %v909_v14, %v908_v13  ;;  %v1780_v17 = vpop.f32.mrb[8].mxu1 }
 0x1d6   : > { %v818_v18 = vadd.f32 %v1780_v17, %v2146_v51  ;;  %v809_v19 = vpop.f32.mrb[9].mxu1 }
 0x1d7   : > { %v810_v20 = vadd.f32 %v2146_v51, %v809_v19  ;;  %v1781_v21 = vpop.f32.mrb[10].mxu1  ;;  %1822 = vmatprep.mubr.bf16.mxu0 %v938_v16 }
 0x1d8   : > { %v821_v22 = vadd.f32 %v1781_v21, %v2146_v51  ;;  %v812_v23 = vpop.f32.mrb[11].mxu1  ;;  %1823 = vmatmul.mubr.bf16.gmra.mrb[36].mxu0 %v939_v15  ;;  %v914_v25 = vmax.f32 %v818_v18, 0.0 }
 0x1d9   : > { %v813_v24 = vadd.f32 %v2146_v51, %v812_v23  ;;  %v912_v27 = vmax.f32 %v810_v20, 0.0 }
 0x1da   : > { %v915_v26 = vmax.f32 %v821_v22, 0.0 }
 0x1db   : > { %v913_v28 = vmax.f32 %v813_v24, 0.0 }
 0x1dc   : > { %v941_v29 = vpack.c.bf16 %v915_v26, %v914_v25 }
 0x1dd   : > { %v940_v30 = vpack.c.bf16 %v913_v28, %v912_v27  ;;  %v1784_v31 = vpop.f32.mrb[12].mxu1 }
 0x1de   : > { %v834_v32 = vadd.f32 %v1784_v31, %v2146_v51  ;;  %v825_v33 = vpop.f32.mrb[13].mxu1 }
 0x1df   : > { %v826_v34 = vadd.f32 %v2146_v51, %v825_v33  ;;  %v1785_v35 = vpop.f32.mrb[14].mxu1  ;;  %1826 = vmatprep.mubr.bf16.mxu0 %v940_v30 }
 0x1e0   : > { %v837_v36 = vadd.f32 %v1785_v35, %v2146_v51  ;;  %v828_v37 = vpop.f32.mrb[15].mxu1  ;;  %1827 = vmatmul.mubr.bf16.gmra.mrb[40].mxu0 %v941_v29  ;;  %v918_v39 = vmax.f32 %v834_v32, 0.0 }
 0x1e1   : > { %v829_v38 = vadd.f32 %v2146_v51, %v828_v37  ;;  %v916_v41 = vmax.f32 %v826_v34, 0.0 }
 0x1e2   : > { %v919_v40 = vmax.f32 %v837_v36, 0.0 }
 0x1e3   : > { %v917_v42 = vmax.f32 %v829_v38, 0.0  ;;  %v2183_v38 = vld [vmem:[%s2318_s6] ss:$0 sm:$0xff] }
 0x1e4   : > { %v943_v43 = vpack.c.bf16 %v919_v40, %v918_v39 }
 0x1e5   : > { %v942_v44 = vpack.c.bf16 %v917_v42, %v916_v41  ;;  %v1788_v45 = vpop.f32.mrb[16].mxu1 }
 0x1e6   : > { %v850_v46 = vadd.f32 %v1788_v45, %v2146_v51  ;;  %v841_v47 = vpop.f32.mrb[17].mxu1 }
 0x1e7   : > { %v842_v61 = vadd.f32 %v2146_v51, %v841_v47  ;;  %v1789_v48 = vpop.f32.mrb[18].mxu1  ;;  %1830 = vmatprep.mubr.bf16.mxu0 %v942_v44 }
 0x1e8   : > { %v853_v49 = vadd.f32 %v1789_v48, %v2146_v51  ;;  %v844_v50 = vpop.f32.mrb[19].mxu1  ;;  %1831 = vmatmul.mubr.bf16.gmra.mrb[44].mxu0 %v943_v43  ;;  %v922_v53 = vmax.f32 %v850_v46, 0.0 }
 0x1e9   : > { %v845_v52 = vadd.f32 %v2146_v51, %v844_v50  ;;  %v920_v55 = vmax.f32 %v842_v61, 0.0 }
 0x1ea   : > { %v923_v54 = vmax.f32 %v853_v49, 0.0 }
 0x1eb   : > { %v921_v56 = vmax.f32 %v845_v52, 0.0 }
 0x1ec   : > { %v945_v57 = vpack.c.bf16 %v923_v54, %v922_v53 }
 0x1ed   : > { %v944_v58 = vpack.c.bf16 %v921_v56, %v920_v55  ;;  %v1792_v59 = vpop.f32.mrb[20].mxu1 }
 0x1ee   : > { %v866_v60 = vadd.f32 %v1792_v59, %v2146_v51  ;;  %v857_v62 = vpop.f32.mrb[21].mxu1 }
 0x1ef   : > { %v858_v63 = vadd.f32 %v2146_v51, %v857_v62  ;;  %v1793_v0 = vpop.f32.mrb[22].mxu1  ;;  %1834 = vmatprep.mubr.bf16.mxu0 %v944_v58 }
 0x1f0   : > { %v869_v1 = vadd.f32 %v1793_v0, %v2146_v51  ;;  %v860_v2 = vpop.f32.mrb[23].mxu1  ;;  %1835 = vmatmul.mubr.bf16.gmra.mrb[48].mxu0 %v945_v57  ;;  %v926_v4 = vmax.f32 %v866_v60, 0.0 }
 0x1f1   : > { %v861_v3 = vadd.f32 %v2146_v51, %v860_v2  ;;  %v924_v6 = vmax.f32 %v858_v63, 0.0 }
 0x1f2   : > { %v927_v5 = vmax.f32 %v869_v1, 0.0 }
 0x1f3   : > { %v925_v7 = vmax.f32 %v861_v3, 0.0 }
 0x1f4   : > { %v947_v8 = vpack.c.bf16 %v927_v5, %v926_v4 }
 0x1f5   : > { %v946_v9 = vpack.c.bf16 %v925_v7, %v924_v6  ;;  %v1796_v10 = vpop.f32.mrb[24].mxu1 }
 0x1f6   : > { %v882_v11 = vadd.f32 %v1796_v10, %v2146_v51  ;;  %v873_v12 = vpop.f32.mrb[25].mxu1 }
 0x1f7   : > { %v874_v13 = vadd.f32 %v2146_v51, %v873_v12  ;;  %v1797_v14 = vpop.f32.mrb[26].mxu1  ;;  %1838 = vmatprep.mubr.bf16.mxu0 %v946_v9 }
 0x1f8   : > { %v885_v15 = vadd.f32 %v1797_v14, %v2146_v51  ;;  %v876_v16 = vpop.f32.mrb[27].mxu1  ;;  %1839 = vmatmul.mubr.bf16.gmra.mrb[52].mxu0 %v947_v8  ;;  %v930_v18 = vmax.f32 %v882_v11, 0.0 }
 0x1f9   : > { %v877_v17 = vadd.f32 %v2146_v51, %v876_v16  ;;  %v928_v20 = vmax.f32 %v874_v13, 0.0 }
 0x1fa   : > { %v931_v19 = vmax.f32 %v885_v15, 0.0 }
 0x1fb   : > { %v929_v21 = vmax.f32 %v877_v17, 0.0 }
 0x1fc   : > { %v949_v22 = vpack.c.bf16 %v931_v19, %v930_v18 }
 0x1fd   : > { %v948_v23 = vpack.c.bf16 %v929_v21, %v928_v20  ;;  %v1800_v24 = vpop.f32.mrb[28].mxu1 }
 0x1fe   : > { %v898_v25 = vadd.f32 %v1800_v24, %v2146_v51  ;;  %v889_v26 = vpop.f32.mrb[29].mxu1 }
 0x1ff   : > { %v890_v27 = vadd.f32 %v2146_v51, %v889_v26  ;;  %v1801_v28 = vpop.f32.mrb[30].mxu1  ;;  %1842 = vmatprep.mubr.bf16.mxu0 %v948_v23 }
 0x200   : > { %v901_v29 = vadd.f32 %v1801_v28, %v2146_v51  ;;  %v892_v30 = vpop.f32.mrb[31].mxu1  ;;  %1843 = vmatmul.mubr.bf16.gmra.mrb[56].mxu0 %v949_v22  ;;  %v934_v32 = vmax.f32 %v898_v25, 0.0 }
 0x201   : > { %v893_v31 = vadd.f32 %v2146_v51, %v892_v30  ;;  %v932_v34 = vmax.f32 %v890_v27, 0.0 }
 0x202   : > { %v935_v33 = vmax.f32 %v901_v29, 0.0 }
 0x203   : > { %v933_v35 = vmax.f32 %v893_v31, 0.0 }
 0x204   : > { %v951_v36 = vpack.c.bf16 %v935_v33, %v934_v32 }
 0x205   : > { %v950_v37 = vpack.c.bf16 %v933_v35, %v932_v34 }
 0x207   : > { %1846 = vmatprep.mubr.bf16.mxu0 %v950_v37 }
 0x208   : > { %1847 = vmatmul.mubr.bf16.gmra.mrb[60].mxu0 %v951_v36 }
 0x2a3   : > { %v1820_v39 = vpop.f32.mrb[32].mxu0 }
 0x2a4   : > { %v1066_v40 = vadd.f32 %v1820_v39, %v2183_v38  ;;  %v1057_v41 = vpop.f32.mrb[33].mxu0 }
 0x2a5   : > { %v1058_v42 = vadd.f32 %v2183_v38, %v1057_v41  ;;  %v1821_v51 = vpop.f32.mrb[34].mxu0 }
 0x2a6   : > { %v1069_v43 = vadd.f32 %v1821_v51, %v2183_v38  ;;  %v1060_v44 = vpop.f32.mrb[35].mxu0  ;;  %v1186_v46 = vmax.f32 %v1066_v40, 0.0 }
 0x2a7   : > { %v1061_v45 = vadd.f32 %v2183_v38, %v1060_v44  ;;  %v1184_v61 = vmax.f32 %v1058_v42, 0.0 }
 0x2a8   : > { %v1187_v47 = vmax.f32 %v1069_v43, 0.0 }
 0x2a9   : > { %v1185_v48 = vmax.f32 %v1061_v45, 0.0 }
 0x2aa   : > { %v1217_v49 = vpack.c.bf16 %v1187_v47, %v1186_v46 }
 0x2ab   : > { %v1216_v50 = vpack.c.bf16 %v1185_v48, %v1184_v61  ;;  %v1824_v52 = vpop.f32.mrb[36].mxu0 }
 0x2ac   : > { %v1082_v53 = vadd.f32 %v1824_v52, %v2183_v38  ;;  %v1073_v54 = vpop.f32.mrb[37].mxu0 }
 0x2ad   : > { %v1074_v55 = vadd.f32 %v2183_v38, %v1073_v54  ;;  %v1825_v56 = vpop.f32.mrb[38].mxu0  ;;  %1858 = vmatprep.mubr.msk.bf16.mxu1 %vm694_vm2, %v1216_v50 }
 0x2ae   : > { %v1085_v57 = vadd.f32 %v1825_v56, %v2183_v38  ;;  %v1076_v58 = vpop.f32.mrb[39].mxu0  ;;  %1859 = vmatmul.mubr.msk.bf16.vlgmr.msra.gmra.mrb[32].mxu1 %vm694_vm2, %v1217_v49  ;;  %v1190_v60 = vmax.f32 %v1082_v53, 0.0 }
 0x2af   : > { %v1077_v59 = vadd.f32 %v2183_v38, %v1076_v58  ;;  %v1188_v63 = vmax.f32 %v1074_v55, 0.0 }
 0x2b0   : > { %v1191_v62 = vmax.f32 %v1085_v57, 0.0 }
 0x2b1   : > { %v1189_v0 = vmax.f32 %v1077_v59, 0.0 }
 0x2b2   : > { %v1219_v1 = vpack.c.bf16 %v1191_v62, %v1190_v60 }
 0x2b3   : > { %v1218_v2 = vpack.c.bf16 %v1189_v0, %v1188_v63  ;;  %v1828_v3 = vpop.f32.mrb[40].mxu0 }
 0x2b4   : > { %v1098_v4 = vadd.f32 %v1828_v3, %v2183_v38  ;;  %v1089_v5 = vpop.f32.mrb[41].mxu0 }
 0x2b5   : > { %v1090_v6 = vadd.f32 %v2183_v38, %v1089_v5  ;;  %v1829_v7 = vpop.f32.mrb[42].mxu0  ;;  %1862 = vmatprep.mubr.msk.bf16.mxu1 %vm694_vm2, %v1218_v2 }
 0x2b6   : > { %v1101_v8 = vadd.f32 %v1829_v7, %v2183_v38  ;;  %v1092_v9 = vpop.f32.mrb[43].mxu0  ;;  %1863 = vmatmul.mubr.msk.bf16.gmra.mrb[36].mxu1 %vm694_vm2, %v1219_v1  ;;  %v1194_v11 = vmax.f32 %v1098_v4, 0.0 }
 0x2b7   : > { %v1093_v10 = vadd.f32 %v2183_v38, %v1092_v9  ;;  %v1192_v13 = vmax.f32 %v1090_v6, 0.0 }
 0x2b8   : > { %v1195_v12 = vmax.f32 %v1101_v8, 0.0 }
 0x2b9   : > { %v1193_v14 = vmax.f32 %v1093_v10, 0.0 }
 0x2ba   : > { %v1221_v15 = vpack.c.bf16 %v1195_v12, %v1194_v11 }
 0x2bb   : > { %v1220_v16 = vpack.c.bf16 %v1193_v14, %v1192_v13  ;;  %v1832_v17 = vpop.f32.mrb[44].mxu0 }
 0x2bc   : > { %v1114_v18 = vadd.f32 %v1832_v17, %v2183_v38  ;;  %v1105_v19 = vpop.f32.mrb[45].mxu0 }
 0x2bd   : > { %v1106_v20 = vadd.f32 %v2183_v38, %v1105_v19  ;;  %v1833_v21 = vpop.f32.mrb[46].mxu0  ;;  %1866 = vmatprep.mubr.msk.bf16.mxu1 %vm694_vm2, %v1220_v16 }
 0x2be   : > { %v1117_v22 = vadd.f32 %v1833_v21, %v2183_v38  ;;  %v1108_v23 = vpop.f32.mrb[47].mxu0  ;;  %1867 = vmatmul.mubr.msk.bf16.gmra.mrb[40].mxu1 %vm694_vm2, %v1221_v15  ;;  %v1198_v25 = vmax.f32 %v1114_v18, 0.0 }
 0x2bf   : > { %v1109_v24 = vadd.f32 %v2183_v38, %v1108_v23  ;;  %v1196_v27 = vmax.f32 %v1106_v20, 0.0 }
 0x2c0   : > { %v1199_v26 = vmax.f32 %v1117_v22, 0.0 }
 0x2c1   : > { %v1197_v28 = vmax.f32 %v1109_v24, 0.0  ;;  %v2236_v24 = vld [vmem:[%s2320_s8] ss:$0 sm:$0xff] }
 0x2c2   : > { %v1223_v29 = vpack.c.bf16 %v1199_v26, %v1198_v25 }
 0x2c3   : > { %v1222_v30 = vpack.c.bf16 %v1197_v28, %v1196_v27  ;;  %v1836_v31 = vpop.f32.mrb[48].mxu0 }
 0x2c4   : > { %v1130_v32 = vadd.f32 %v1836_v31, %v2183_v38  ;;  %v1121_v33 = vpop.f32.mrb[49].mxu0 }
 0x2c5   : > { %v1122_v34 = vadd.f32 %v2183_v38, %v1121_v33  ;;  %v1837_v35 = vpop.f32.mrb[50].mxu0  ;;  %1870 = vmatprep.mubr.msk.bf16.mxu1 %vm694_vm2, %v1222_v30 }
 0x2c6   : > { %v1133_v36 = vadd.f32 %v1837_v35, %v2183_v38  ;;  %v1124_v37 = vpop.f32.mrb[51].mxu0  ;;  %1871 = vmatmul.mubr.msk.bf16.gmra.mrb[44].mxu1 %vm694_vm2, %v1223_v29  ;;  %v1202_v40 = vmax.f32 %v1130_v32, 0.0 }
 0x2c7   : > { %v1125_v39 = vadd.f32 %v2183_v38, %v1124_v37  ;;  %v1200_v42 = vmax.f32 %v1122_v34, 0.0 }
 0x2c8   : > { %v1203_v41 = vmax.f32 %v1133_v36, 0.0 }
 0x2c9   : > { %v1201_v51 = vmax.f32 %v1125_v39, 0.0 }
 0x2ca   : > { %v1225_v43 = vpack.c.bf16 %v1203_v41, %v1202_v40 }
 0x2cb   : > { %v1224_v44 = vpack.c.bf16 %v1201_v51, %v1200_v42  ;;  %v1840_v45 = vpop.f32.mrb[52].mxu0 }
 0x2cc   : > { %v1146_v46 = vadd.f32 %v1840_v45, %v2183_v38  ;;  %v1137_v47 = vpop.f32.mrb[53].mxu0 }
 0x2cd   : > { %v1138_v61 = vadd.f32 %v2183_v38, %v1137_v47  ;;  %v1841_v48 = vpop.f32.mrb[54].mxu0  ;;  %1874 = vmatprep.mubr.msk.bf16.mxu1 %vm694_vm2, %v1224_v44 }
 0x2ce   : > { %v1149_v49 = vadd.f32 %v1841_v48, %v2183_v38  ;;  %v1140_v50 = vpop.f32.mrb[55].mxu0  ;;  %1875 = vmatmul.mubr.msk.bf16.gmra.mrb[48].mxu1 %vm694_vm2, %v1225_v43  ;;  %v1206_v53 = vmax.f32 %v1146_v46, 0.0 }
 0x2cf   : > { %v1141_v52 = vadd.f32 %v2183_v38, %v1140_v50  ;;  %v1204_v55 = vmax.f32 %v1138_v61, 0.0 }
 0x2d0   : > { %v1207_v54 = vmax.f32 %v1149_v49, 0.0 }
 0x2d1   : > { %v1205_v56 = vmax.f32 %v1141_v52, 0.0 }
 0x2d2   : > { %v1227_v57 = vpack.c.bf16 %v1207_v54, %v1206_v53 }
 0x2d3   : > { %v1226_v58 = vpack.c.bf16 %v1205_v56, %v1204_v55  ;;  %v1844_v59 = vpop.f32.mrb[56].mxu0 }
 0x2d4   : > { %v1162_v60 = vadd.f32 %v1844_v59, %v2183_v38  ;;  %v1153_v62 = vpop.f32.mrb[57].mxu0 }
 0x2d5   : > { %v1154_v63 = vadd.f32 %v2183_v38, %v1153_v62  ;;  %v1845_v0 = vpop.f32.mrb[58].mxu0  ;;  %1878 = vmatprep.mubr.msk.bf16.mxu1 %vm694_vm2, %v1226_v58 }
 0x2d6   : > { %v1165_v1 = vadd.f32 %v1845_v0, %v2183_v38  ;;  %v1156_v2 = vpop.f32.mrb[59].mxu0  ;;  %1879 = vmatmul.mubr.msk.bf16.gmra.mrb[52].mxu1 %vm694_vm2, %v1227_v57  ;;  %v1210_v4 = vmax.f32 %v1162_v60, 0.0 }
 0x2d7   : > { %v1157_v3 = vadd.f32 %v2183_v38, %v1156_v2  ;;  %v1208_v6 = vmax.f32 %v1154_v63, 0.0 }
 0x2d8   : > { %v1211_v5 = vmax.f32 %v1165_v1, 0.0 }
 0x2d9   : > { %v1209_v7 = vmax.f32 %v1157_v3, 0.0 }
 0x2da   : > { %v1229_v8 = vpack.c.bf16 %v1211_v5, %v1210_v4 }
 0x2db   : > { %v1228_v9 = vpack.c.bf16 %v1209_v7, %v1208_v6  ;;  %v1848_v10 = vpop.f32.mrb[60].mxu0 }
 0x2dc   : > { %v1178_v11 = vadd.f32 %v1848_v10, %v2183_v38  ;;  %v1169_v12 = vpop.f32.mrb[61].mxu0 }
 0x2dd   : > { %v1170_v13 = vadd.f32 %v2183_v38, %v1169_v12  ;;  %v1849_v14 = vpop.f32.mrb[62].mxu0  ;;  %1882 = vmatprep.mubr.msk.bf16.mxu1 %vm694_vm2, %v1228_v9 }
 0x2de   : > { %v1181_v15 = vadd.f32 %v1849_v14, %v2183_v38  ;;  %v1172_v16 = vpop.f32.mrb[63].mxu0  ;;  %1883 = vmatmul.mubr.msk.bf16.gmra.mrb[56].mxu1 %vm694_vm2, %v1229_v8  ;;  %v1214_v18 = vmax.f32 %v1178_v11, 0.0 }
 0x2df   : > { %v1173_v17 = vadd.f32 %v2183_v38, %v1172_v16  ;;  %v1212_v20 = vmax.f32 %v1170_v13, 0.0 }
 0x2e0   : > { %v1215_v19 = vmax.f32 %v1181_v15, 0.0 }
 0x2e1   : > { %v1213_v21 = vmax.f32 %v1173_v17, 0.0 }
 0x2e2   : > { %v1231_v22 = vpack.c.bf16 %v1215_v19, %v1214_v18 }
 0x2e3   : > { %v1230_v23 = vpack.c.bf16 %v1213_v21, %v1212_v20 }
 0x2e5   : > { %1886 = vmatprep.mubr.msk.bf16.mxu1 %vm694_vm2, %v1230_v23 }
 0x2e6   : > { %1887 = vmatmul.mubr.msk.bf16.gmra.mrb[60].mxu1 %vm694_vm2, %v1231_v22 }
 0x381   : > { %v1860_v38 = vpop.f32.mrb[32].mxu1 }
 0x382   : > { %v1362_v25 = vadd.f32 %v1860_v38, %v2236_v24  ;;  %v1353_v26 = vpop.f32.mrb[33].mxu1 }
 0x383   : > { %v1354_v27 = vadd.f32 %v2236_v24, %v1353_v26  ;;  %v1861_v28 = vpop.f32.mrb[34].mxu1 }
 0x384   : > { %1482 = vst [vmem:[%s2243_s24 + $0x10] sm:$0xff] %v1362_v25  ;;  %v1365_v29 = vadd.f32 %v1861_v28, %v2236_v24  ;;  %v1356_v30 = vpop.f32.mrb[35].mxu1 }
 0x385   : > { %1480 = vst [vmem:[%s2243_s24] sm:$0xff] %v1354_v27  ;;  %v1357_v31 = vadd.f32 %v2236_v24, %v1356_v30 }
 0x386   : > { %1483 = vst [vmem:[%s2243_s24 + $0x18] sm:$0xff] %v1365_v29 }
 0x387   : > { %1481 = vst [vmem:[%s2243_s24 + $0x8] sm:$0xff] %v1357_v31 }
 0x389   : > { %v1864_v32 = vpop.f32.mrb[36].mxu1 }
 0x38a   : > { %v1378_v33 = vadd.f32 %v1864_v32, %v2236_v24  ;;  %v1369_v34 = vpop.f32.mrb[37].mxu1 }
 0x38b   : > { %v1370_v35 = vadd.f32 %v2236_v24, %v1369_v34  ;;  %v1865_v36 = vpop.f32.mrb[38].mxu1 }
 0x38c   : > { %1486 = vst [vmem:[%s2243_s24 + $0x30] sm:$0xff] %v1378_v33  ;;  %v1381_v37 = vadd.f32 %v1865_v36, %v2236_v24  ;;  %v1372_v39 = vpop.f32.mrb[39].mxu1 }
 0x38d   : > { %1484 = vst [vmem:[%s2243_s24 + $0x20] sm:$0xff] %v1370_v35  ;;  %v1373_v40 = vadd.f32 %v2236_v24, %v1372_v39 }
 0x38e   : > { %1487 = vst [vmem:[%s2243_s24 + $0x38] sm:$0xff] %v1381_v37 }
 0x38f   : > { %1485 = vst [vmem:[%s2243_s24 + $0x28] sm:$0xff] %v1373_v40 }
 0x391   : > { %v1868_v41 = vpop.f32.mrb[40].mxu1 }
 0x392   : > { %v1394_v42 = vadd.f32 %v1868_v41, %v2236_v24  ;;  %v1385_v51 = vpop.f32.mrb[41].mxu1 }
 0x393   : > { %v1386_v43 = vadd.f32 %v2236_v24, %v1385_v51  ;;  %v1869_v44 = vpop.f32.mrb[42].mxu1 }
 0x394   : > { %1490 = vst [vmem:[%s2243_s24 + $0x50] sm:$0xff] %v1394_v42  ;;  %v1397_v45 = vadd.f32 %v1869_v44, %v2236_v24  ;;  %v1388_v46 = vpop.f32.mrb[43].mxu1 }
 0x395   : > { %1488 = vst [vmem:[%s2243_s24 + $0x40] sm:$0xff] %v1386_v43  ;;  %v1389_v47 = vadd.f32 %v2236_v24, %v1388_v46 }
 0x396   : > { %1491 = vst [vmem:[%s2243_s24 + $0x58] sm:$0xff] %v1397_v45 }
 0x397   : > { %1489 = vst [vmem:[%s2243_s24 + $0x48] sm:$0xff] %v1389_v47 }
 0x399   : > { %v1872_v61 = vpop.f32.mrb[44].mxu1 }
 0x39a   : > { %v1410_v48 = vadd.f32 %v1872_v61, %v2236_v24  ;;  %v1401_v49 = vpop.f32.mrb[45].mxu1 }
 0x39b   : > { %v1402_v50 = vadd.f32 %v2236_v24, %v1401_v49  ;;  %v1873_v52 = vpop.f32.mrb[46].mxu1 }
 0x39c   : > { %1494 = vst [vmem:[%s2243_s24 + $0x70] sm:$0xff] %v1410_v48  ;;  %v1413_v53 = vadd.f32 %v1873_v52, %v2236_v24  ;;  %v1404_v54 = vpop.f32.mrb[47].mxu1 }
 0x39d   : > { %1492 = vst [vmem:[%s2243_s24 + $0x60] sm:$0xff] %v1402_v50  ;;  %v1405_v55 = vadd.f32 %v2236_v24, %v1404_v54 }
 0x39e   : > { %1495 = vst [vmem:[%s2243_s24 + $0x78] sm:$0xff] %v1413_v53 }
 0x39f   : > { %1493 = vst [vmem:[%s2243_s24 + $0x68] sm:$0xff] %v1405_v55 }
 0x3a1   : > { %v1876_v56 = vpop.f32.mrb[48].mxu1 }
 0x3a2   : > { %v1426_v57 = vadd.f32 %v1876_v56, %v2236_v24  ;;  %v1417_v58 = vpop.f32.mrb[49].mxu1 }
 0x3a3   : > { %v1418_v59 = vadd.f32 %v2236_v24, %v1417_v58  ;;  %v1877_v60 = vpop.f32.mrb[50].mxu1 }
 0x3a4   : > { %1498 = vst [vmem:[%s2243_s24 + $0x90] sm:$0xff] %v1426_v57  ;;  %v1429_v62 = vadd.f32 %v1877_v60, %v2236_v24  ;;  %v1420_v63 = vpop.f32.mrb[51].mxu1 }
 0x3a5   : > { %1496 = vst [vmem:[%s2243_s24 + $0x80] sm:$0xff] %v1418_v59  ;;  %v1421_v0 = vadd.f32 %v2236_v24, %v1420_v63 }
 0x3a6   : > { %1499 = vst [vmem:[%s2243_s24 + $0x98] sm:$0xff] %v1429_v62 }
 0x3a7   : > { %1497 = vst [vmem:[%s2243_s24 + $0x88] sm:$0xff] %v1421_v0 }
 0x3a9   : > { %v1880_v1 = vpop.f32.mrb[52].mxu1 }
 0x3aa   : > { %v1442_v2 = vadd.f32 %v1880_v1, %v2236_v24  ;;  %v1433_v3 = vpop.f32.mrb[53].mxu1 }
 0x3ab   : > { %v1434_v4 = vadd.f32 %v2236_v24, %v1433_v3  ;;  %v1881_v5 = vpop.f32.mrb[54].mxu1 }
 0x3ac   : > { %1502 = vst [vmem:[%s2243_s24 + $0xb0] sm:$0xff] %v1442_v2  ;;  %v1445_v6 = vadd.f32 %v1881_v5, %v2236_v24  ;;  %v1436_v7 = vpop.f32.mrb[55].mxu1 }
 0x3ad   : > { %1500 = vst [vmem:[%s2243_s24 + $0xa0] sm:$0xff] %v1434_v4  ;;  %v1437_v8 = vadd.f32 %v2236_v24, %v1436_v7 }
 0x3ae   : > { %1503 = vst [vmem:[%s2243_s24 + $0xb8] sm:$0xff] %v1445_v6 }
 0x3af   : > { %1501 = vst [vmem:[%s2243_s24 + $0xa8] sm:$0xff] %v1437_v8 }
 0x3b1   : > { %v1884_v9 = vpop.f32.mrb[56].mxu1 }
 0x3b2   : > { %v1458_v10 = vadd.f32 %v1884_v9, %v2236_v24  ;;  %v1449_v11 = vpop.f32.mrb[57].mxu1 }
 0x3b3   : > { %v1450_v12 = vadd.f32 %v2236_v24, %v1449_v11  ;;  %v1885_v13 = vpop.f32.mrb[58].mxu1 }
 0x3b4   : > { %1506 = vst [vmem:[%s2243_s24 + $0xd0] sm:$0xff] %v1458_v10  ;;  %v1461_v14 = vadd.f32 %v1885_v13, %v2236_v24  ;;  %v1452_v15 = vpop.f32.mrb[59].mxu1 }
 0x3b5   : > { %1504 = vst [vmem:[%s2243_s24 + $0xc0] sm:$0xff] %v1450_v12  ;;  %v1453_v16 = vadd.f32 %v2236_v24, %v1452_v15 }
 0x3b6   : > { %1507 = vst [vmem:[%s2243_s24 + $0xd8] sm:$0xff] %v1461_v14 }
 0x3b7   : > { %1505 = vst [vmem:[%s2243_s24 + $0xc8] sm:$0xff] %v1453_v16 }
 0x3b9   : > { %v1888_v17 = vpop.f32.mrb[60].mxu1 }
 0x3ba   : > { %v1474_v18 = vadd.f32 %v1888_v17, %v2236_v24  ;;  %v1465_v19 = vpop.f32.mrb[61].mxu1 }
 0x3bb   : > { %v1466_v20 = vadd.f32 %v2236_v24, %v1465_v19  ;;  %v1889_v21 = vpop.f32.mrb[62].mxu1 }
 0x3bc   : > { %1510 = vst [vmem:[%s2243_s24 + $0xf0] sm:$0xff] %v1474_v18  ;;  %v1477_v22 = vadd.f32 %v1889_v21, %v2236_v24  ;;  %v1468_v23 = vpop.f32.mrb[63].mxu1 }
 0x3bd   : > { %1508 = vst [vmem:[%s2243_s24 + $0xe0] sm:$0xff] %v1466_v20  ;;  %v1469_v38 = vadd.f32 %v2236_v24, %v1468_v23 }
 0x3be   : > { %1511 = vst [vmem:[%s2243_s24 + $0xf8] sm:$0xff] %v1477_v22 }
 0x3bf   : > { %1509 = vst [vmem:[%s2243_s24 + $0xe8] sm:$0xff] %v1469_v38 }
 0x3c0 PF: > { %s19_s30 = sadd.s32 1, %s1921_s30  }
 0x3c1   : > { %p16_p4 = scmp.ge.s32.totalorder %s19_s30, 6  }
 0x3c3   :  { %18 = sbr.rel (!%p16_p4) target bundleno = 1 (0x1), region = 86 }

</bundles_post_ra>
